<compile_context>
chip_gen: v7x
topology: tpu7x:2x2x1
jax: 0.10.0
libtpu: 0.0.40
codegen_flags: <defaults>
</compile_context>

<pallas_src>
import functools

import jax
import jax.numpy as jnp
from jax import lax
from jax.experimental import pallas as pl
from jax.experimental.pallas import tpu as pltpu


def cnn_kernel(x_ref, w_ref, bc_ref, wf_ref, bf_ref, sel_ref, out_ref, *, L):
    # x_ref  : (tile_b*L, Cin)      bf16 flat input rows for this batch tile
    # w_ref  : (3*Cin, Cout)        bf16 stacked conv taps (rows k*Cin+ci = conv_w[:, ci, k])
    # bc_ref : (1, Cout) f32 conv bias      wf_ref: (1, Cout) f32 fc weight row
    # bf_ref : (1, 1)    f32 fc bias        sel_ref: (tile_b, tile_b*L) f32 pool/mean selector
    # out_ref: (tile_b, 1) f32 per-sample regression outputs
    M, cin = x_ref.shape

    x = x_ref[...]                                                            # (M, Cin) bf16

    # Conv1d(kernel=3, padding=1): three small MXU matmuls, f32 accumulation.
    # t_k[r] = x[r] . w_k ; conv output y[l] = t0[l-1] + t1[l] + t2[l+1] (zero padded).
    t0 = jnp.dot(x, w_ref[0 * cin:1 * cin, :], preferred_element_type=jnp.float32)
    t1 = jnp.dot(x, w_ref[1 * cin:2 * cin, :], preferred_element_type=jnp.float32)
    t2 = jnp.dot(x, w_ref[2 * cin:3 * cin, :], preferred_element_type=jnp.float32)

    rows = lax.broadcasted_iota(jnp.int32, (M, 1), 0)
    if (L & (L - 1)) == 0:
        pos = rows & (L - 1)            # in-sample position (bitwise, L is a power of two)
    else:
        pos = rows % L

    # Tap shifts on the f32 outputs via XLU sublane rolls; sample-boundary rows are masked
    # so rolls never leak data across samples (or across the block wrap-around).
    y = t1
    y = y + jnp.where(pos == 0, 0.0, pltpu.roll(t0, 1, axis=0))               # left tap
    y = y + jnp.where(pos == L - 1, 0.0, pltpu.roll(t2, M - 1, axis=0))       # right tap
    y = jnp.maximum(y + bc_ref[...], 0.0)                                     # bias + ReLU

    # MaxPool1d(2,2): pair[r] = max(y[r], y[r+1]).  Odd rows and the wrap-around row are
    # never selected by `sel`, so no extra mask is needed here.
    pair = jnp.maximum(y, pltpu.roll(y, M - 1, axis=0))                       # (M, Cout)

    # Pool selection + global mean as ONE MXU matmul against the constant selector:
    # feat[b, c] = (2/L) * sum_p pair[b*L + 2p, c].  (The MXU is otherwise idle here;
    # this removes the old O(tile_b^2 * L) VPU compare/select segment-sum.)
    feat = jnp.dot(sel_ref[...], pair, preferred_element_type=jnp.float32)    # (tile_b, Cout)

    # Linear(Cout -> 1): fold the fc weight row in and lane-reduce.
    out_ref[...] = jnp.sum(feat * wf_ref[...], axis=1, keepdims=True) + bf_ref[...]
    # TODO(synk): nn.Dropout is identity at inference; no RNG/training path implemented.


def cnn_forward(x, conv_w, conv_b, fc_w, fc_b):
    """x: (B, L, Cin) f32 (module input before its internal permute).
    conv_w: (Cout, Cin, K) torch layout. conv_b: (Cout,). fc_w: (1, Cout). fc_b: (1,).
    Returns (B, 1) f32."""
    B, L, Cin = x.shape
    Cout, _, K = conv_w.shape
    assert K == 3, "kernel assumes kernel_size=3, padding=1"
    assert L % 2 == 0, "MaxPool1d(2,2) handling assumes even sequence length"

    # ---- batch tiling (scaled path) ----------------------------------------
    # tile_b capped at 128: blocks stay 8-sublane aligned, the per-step working set
    # (~5 MiB at L=16, Cout=64) fits every generation's scoped-VMEM default, and batches
    # >= 256 get multiple "parallel" grid steps for v7x's 2 TensorCores.
    tile_b = B if B <= 128 else 128
    n_tiles = (B + tile_b - 1) // tile_b
    Bp = n_tiles * tile_b                      # pad the ragged tail tile instead of dropping it

    xb = x.astype(jnp.bfloat16)                # bf16 operand: halves HBM read bytes (f32 acc in kernel)
    if Bp != B:
        xb = jnp.pad(xb, ((0, Bp - B), (0, 0), (0, 0)))
    x2 = xb.reshape(Bp * L, Cin)               # free row-major reshape -- NO im2col

    # Stacked conv taps: row k*Cin + ci = conv_w[:, ci, k].
    w = jnp.transpose(conv_w, (2, 1, 0)).reshape(K * Cin, Cout).astype(jnp.bfloat16)
    bc = conv_b.reshape(1, Cout).astype(jnp.float32)
    wf = fc_w.reshape(1, Cout).astype(jnp.float32)
    bf = fc_b.reshape(1, 1).astype(jnp.float32)

    # Constant pool/mean selector, shared by every grid step:
    # sel[b, r] = 2/L if (r // L == b and r is even) else 0.
    M = tile_b * L
    r = jnp.arange(M, dtype=jnp.int32)
    b_idx = jnp.arange(tile_b, dtype=jnp.int32)
    sel = jnp.where((r[None, :] // L == b_idx[:, None]) & (r[None, :] % 2 == 0),
                    jnp.float32(2.0 / L), jnp.float32(0.0))                   # (tile_b, M)

    cost = pl.CostEstimate(
        flops=int(2 * Bp * L * Cin * Cout * K          # conv matmuls
                  + 2 * Bp * tile_b * L * Cout         # selector matmul
                  + 8 * Bp * L * Cout),                # elementwise
        transcendentals=0,
        bytes_accessed=int(x2.size * 2 + w.size * 2 + n_tiles * sel.size * 4
                           + (bc.size + wf.size + bf.size + Bp) * 4),
    )

    out = pl.pallas_call(
        functools.partial(cnn_kernel, L=L),
        out_shape=jax.ShapeDtypeStruct((Bp, 1), jnp.float32),
        grid=(n_tiles,),
        in_specs=[
            pl.BlockSpec((tile_b * L, Cin), lambda b: (b, 0)),
            pl.BlockSpec((K * Cin, Cout), lambda b: (0, 0)),
            pl.BlockSpec((1, Cout), lambda b: (0, 0)),
            pl.BlockSpec((1, Cout), lambda b: (0, 0)),
            pl.BlockSpec((1, 1), lambda b: (0, 0)),
            pl.BlockSpec((tile_b, tile_b * L), lambda b: (0, 0)),
        ],
        out_specs=pl.BlockSpec((tile_b, 1), lambda b: (b, 0)),
        compiler_params=pltpu.CompilerParams(dimension_semantics=("parallel",)),
        cost_estimate=cost,
    )(x2, w, bc, wf, bf, sel)
    return out[:B]


def reference_forward(x, conv_w, conv_b, fc_w, fc_b):
    """Pure-JAX reference replicating the PyTorch forward (eval mode)."""
    xt = jnp.transpose(x, (0, 2, 1))                            # (B, Cin, L)
    y = lax.conv_general_dilated(
        xt, conv_w, window_strides=(1,), padding=((1, 1),),
        dimension_numbers=("NCH", "OIH", "NCH"))
    y = jnp.maximum(y + conv_b[None, :, None], 0.0)
    B, C, L = y.shape
    y = y.reshape(B, C, L // 2, 2).max(axis=-1)                 # MaxPool1d(2,2)
    feat = y.mean(axis=2)                                       # (B, C)
    return feat @ fc_w.T + fc_b                                 # (B, 1)


if __name__ == "__main__":
    # Small shapes consistent with the module: (batch, seq_len, input_size)
    B, L, Cin = 2, 16, 8
    Cout, K = 64, 3

    key = jax.random.PRNGKey(0)
    kx, kw, kb, kfw, kfb = jax.random.split(key, 5)

    x = jax.random.normal(kx, (B, L, Cin), dtype=jnp.float32)
    conv_w = jax.random.normal(kw, (Cout, Cin, K), dtype=jnp.float32) * 0.1
    conv_b = jax.random.normal(kb, (Cout,), dtype=jnp.float32) * 0.1
    fc_w = jax.random.normal(kfw, (1, Cout), dtype=jnp.float32) * 0.1
    fc_b = jax.random.normal(kfb, (1,), dtype=jnp.float32) * 0.1

    out = cnn_forward(x, conv_w, conv_b, fc_w, fc_b)
    out = jax.block_until_ready(out)
    assert out.shape == (B, 1), out.shape

    # Tight check: reference fed the SAME bf16-rounded matmul operands (validates kernel math).
    xq = x.astype(jnp.bfloat16).astype(jnp.float32)
    wq = conv_w.astype(jnp.bfloat16).astype(jnp.float32)
    ref_q = reference_forward(xq, wq, conv_b, fc_w, fc_b)
    assert jnp.allclose(out, ref_q, atol=1e-4, rtol=1e-4), (out, ref_q)

    # Loose sanity check vs. the full-f32 reference (bf16 input rounding gives ~1e-3 abs drift).
    ref = reference_forward(x, conv_w, conv_b, fc_w, fc_b)
    assert jnp.allclose(out, ref, atol=2e-2, rtol=2e-2), (out, ref)

    print("KERNEL_OK")
</pallas_src>

<mosaic_0001>
module attributes {stable_mosaic.version = 11 : i64} {
  func.func @cnn_kernel(%arg0: i32, %arg1: memref<32x8xbf16, #tpu.memory_space<vmem>>, %arg2: memref<24x64xbf16, #tpu.memory_space<vmem>>, %arg3: memref<1x64xf32, #tpu.memory_space<vmem>>, %arg4: memref<1x64xf32, #tpu.memory_space<vmem>>, %arg5: memref<1x1xf32, #tpu.memory_space<vmem>>, %arg6: memref<2x32xf32, #tpu.memory_space<vmem>>, %arg7: memref<2x1xf32, #tpu.memory_space<vmem>>) attributes {dimension_semantics = [#tpu.dimension_semantics<parallel>], iteration_bounds = array<i64: 1>, scalar_prefetch = 0 : i64, scratch_operands = 0 : i64, tpu.core_type = #tpu.core_type<tc>, window_params = [{transform_indices = @transform_0, window_bounds = array<i64: 32, 8>}, {pipeline_mode = #tpu.pipeline_mode<synchronous>, transform_indices = @transform_1, window_bounds = array<i64: 24, 64>}, {pipeline_mode = #tpu.pipeline_mode<synchronous>, transform_indices = @transform_2, window_bounds = array<i64: 1, 64>}, {pipeline_mode = #tpu.pipeline_mode<synchronous>, transform_indices = @transform_3, window_bounds = array<i64: 1, 64>}, {pipeline_mode = #tpu.pipeline_mode<synchronous>, transform_indices = @transform_4, window_bounds = array<i64: 1, 1>}, {pipeline_mode = #tpu.pipeline_mode<synchronous>, transform_indices = @transform_5, window_bounds = array<i64: 2, 32>}, {transform_indices = @transform_6, window_bounds = array<i64: 2, 1>}]} {
    %c0 = arith.constant 0 : index
    %c0_0 = arith.constant 0 : index
    %0 = vector.load %arg1[%c0, %c0_0] : memref<32x8xbf16, #tpu.memory_space<vmem>>, vector<32x8xbf16>
    %c0_1 = arith.constant 0 : index
    %c0_2 = arith.constant 0 : index
    %1 = vector.load %arg2[%c0_1, %c0_2] : memref<24x64xbf16, #tpu.memory_space<vmem>>, vector<8x64xbf16>
    %cst = arith.constant dense<0.000000e+00> : vector<32x64xf32>
    %2 = tpu.matmul %0, %1, %cst {dimension_numbers = #tpu.dot_dimension_numbers<[1], [0], [0], [1], [0, 0, 1, 1], [], []>} : vector<32x8xbf16>, vector<8x64xbf16>, vector<32x64xf32> -> vector<32x64xf32>
    %c8 = arith.constant 8 : index
    %c0_3 = arith.constant 0 : index
    %3 = vector.load %arg2[%c8, %c0_3] : memref<24x64xbf16, #tpu.memory_space<vmem>>, vector<8x64xbf16>
    %cst_4 = arith.constant dense<0.000000e+00> : vector<32x64xf32>
    %4 = tpu.matmul %0, %3, %cst_4 {dimension_numbers = #tpu.dot_dimension_numbers<[1], [0], [0], [1], [0, 0, 1, 1], [], []>} : vector<32x8xbf16>, vector<8x64xbf16>, vector<32x64xf32> -> vector<32x64xf32>
    %c16 = arith.constant 16 : index
    %c0_5 = arith.constant 0 : index
    %5 = vector.load %arg2[%c16, %c0_5] : memref<24x64xbf16, #tpu.memory_space<vmem>>, vector<8x64xbf16>
    %cst_6 = arith.constant dense<0.000000e+00> : vector<32x64xf32>
    %6 = tpu.matmul %0, %5, %cst_6 {dimension_numbers = #tpu.dot_dimension_numbers<[1], [0], [0], [1], [0, 0, 1, 1], [], []>} : vector<32x8xbf16>, vector<8x64xbf16>, vector<32x64xf32> -> vector<32x64xf32>
    %7 = tpu.iota {dimensions = array<i32: 0>} : vector<32x1xi32>
    %c15_i32 = arith.constant 15 : i32
    %8 = vector.broadcast %c15_i32 : i32 to vector<32x1xi32>
    %9 = arith.andi %7, %8 : vector<32x1xi32>
    %c0_i32 = arith.constant 0 : i32
    %10 = vector.broadcast %c0_i32 : i32 to vector<32x1xi32>
    %11 = arith.cmpi eq, %9, %10 : vector<32x1xi32>
    %c1_i32 = arith.constant 1 : i32
    %12 = tpu.dynamic_rotate %2 by %c1_i32 dim 0 : vector<32x64xf32>, i32 -> vector<32x64xf32>
    %cst_7 = arith.constant 0.000000e+00 : f32
    %13 = vector.shape_cast %11 : vector<32x1xi1> to vector<32x1xi1>
    %14 = vector.broadcast %13 : vector<32x1xi1> to vector<32x64xi1>
    %15 = vector.broadcast %cst_7 : f32 to vector<32x64xf32>
    %16 = arith.select %14, %15, %12 : vector<32x64xi1>, vector<32x64xf32>
    %17 = arith.addf %4, %16 : vector<32x64xf32>
    %c15_i32_8 = arith.constant 15 : i32
    %18 = vector.broadcast %c15_i32_8 : i32 to vector<32x1xi32>
    %19 = arith.cmpi eq, %9, %18 : vector<32x1xi32>
    %c31_i32 = arith.constant 31 : i32
    %20 = tpu.dynamic_rotate %6 by %c31_i32 dim 0 : vector<32x64xf32>, i32 -> vector<32x64xf32>
    %cst_9 = arith.constant 0.000000e+00 : f32
    %21 = vector.shape_cast %19 : vector<32x1xi1> to vector<32x1xi1>
    %22 = vector.broadcast %21 : vector<32x1xi1> to vector<32x64xi1>
    %23 = vector.broadcast %cst_9 : f32 to vector<32x64xf32>
    %24 = arith.select %22, %23, %20 : vector<32x64xi1>, vector<32x64xf32>
    %25 = arith.addf %17, %24 : vector<32x64xf32>
    %c0_10 = arith.constant 0 : index
    %c0_11 = arith.constant 0 : index
    %26 = vector.load %arg3[%c0_10, %c0_11] : memref<1x64xf32, #tpu.memory_space<vmem>>, vector<1x64xf32>
    %27 = vector.broadcast %26 : vector<1x64xf32> to vector<32x64xf32>
    %28 = arith.addf %25, %27 : vector<32x64xf32>
    %cst_12 = arith.constant 0.000000e+00 : f32
    %29 = vector.broadcast %cst_12 : f32 to vector<32x64xf32>
    %30 = arith.maximumf %28, %29 : vector<32x64xf32>
    %c31_i32_13 = arith.constant 31 : i32
    %31 = tpu.dynamic_rotate %30 by %c31_i32_13 dim 0 : vector<32x64xf32>, i32 -> vector<32x64xf32>
    %32 = arith.maximumf %30, %31 : vector<32x64xf32>
    %c0_14 = arith.constant 0 : index
    %c0_15 = arith.constant 0 : index
    %33 = vector.load %arg6[%c0_14, %c0_15] : memref<2x32xf32, #tpu.memory_space<vmem>>, vector<2x32xf32>
    %cst_16 = arith.constant dense<0.000000e+00> : vector<2x64xf32>
    %34 = tpu.matmul %33, %32, %cst_16 {dimension_numbers = #tpu.dot_dimension_numbers<[1], [0], [0], [1], [0, 0, 1, 1], [], []>} : vector<2x32xf32>, vector<32x64xf32>, vector<2x64xf32> -> vector<2x64xf32>
    %c0_17 = arith.constant 0 : index
    %c0_18 = arith.constant 0 : index
    %35 = vector.load %arg4[%c0_17, %c0_18] : memref<1x64xf32, #tpu.memory_space<vmem>>, vector<1x64xf32>
    %36 = vector.broadcast %35 : vector<1x64xf32> to vector<2x64xf32>
    %37 = arith.mulf %34, %36 : vector<2x64xf32>
    %cst_19 = arith.constant dense<0.000000e+00> : vector<2xf32>
    %38 = vector.multi_reduction <add>, %37, %cst_19 [1] : vector<2x64xf32> to vector<2xf32>
    %39 = vector.shape_cast %38 : vector<2xf32> to vector<2x1xf32>
    %c0_20 = arith.constant 0 : index
    %c0_21 = arith.constant 0 : index
    %40 = vector.load %arg5[%c0_20, %c0_21] : memref<1x1xf32, #tpu.memory_space<vmem>>, vector<1x1xf32>
    %41 = vector.broadcast %40 : vector<1x1xf32> to vector<2x1xf32>
    %42 = arith.addf %39, %41 : vector<2x1xf32>
    %c0_22 = arith.constant 0 : index
    %c0_23 = arith.constant 0 : index
    %43 = vector.load %arg7[%c0_22, %c0_23] : memref<2x1xf32, #tpu.memory_space<vmem>>, vector<2x1xf32>
    tpu.vector_store %arg7[%c0_22, %c0_23], %42 {strides = array<i32>} : memref<2x1xf32, #tpu.memory_space<vmem>>, vector<2x1xf32>,
    return
  }
  func.func @transform_0(%arg0: i32) -> (i32, i32) {
    %c0_i32 = arith.constant 0 : i32
    %c0_i32_0 = arith.constant 0 : i32
    return %arg0, %c0_i32 : i32, i32
  }
  func.func @transform_1(%arg0: i32) -> (i32, i32) {
    %c0_i32 = arith.constant 0 : i32
    %c0_i32_0 = arith.constant 0 : i32
    %c0_i32_1 = arith.constant 0 : i32
    return %c0_i32, %c0_i32_0 : i32, i32
  }
  func.func @transform_2(%arg0: i32) -> (i32, i32) {
    %c0_i32 = arith.constant 0 : i32
    %c0_i32_0 = arith.constant 0 : i32
    %c0_i32_1 = arith.constant 0 : i32
    return %c0_i32, %c0_i32_0 : i32, i32
  }
  func.func @transform_3(%arg0: i32) -> (i32, i32) {
    %c0_i32 = arith.constant 0 : i32
    %c0_i32_0 = arith.constant 0 : i32
    %c0_i32_1 = arith.constant 0 : i32
    return %c0_i32, %c0_i32_0 : i32, i32
  }
  func.func @transform_4(%arg0: i32) -> (i32, i32) {
    %c0_i32 = arith.constant 0 : i32
    %c0_i32_0 = arith.constant 0 : i32
    %c0_i32_1 = arith.constant 0 : i32
    return %c0_i32, %c0_i32_0 : i32, i32
  }
  func.func @transform_5(%arg0: i32) -> (i32, i32) {
    %c0_i32 = arith.constant 0 : i32
    %c0_i32_0 = arith.constant 0 : i32
    %c0_i32_1 = arith.constant 0 : i32
    return %c0_i32, %c0_i32_0 : i32, i32
  }
  func.func @transform_6(%arg0: i32) -> (i32, i32) {
    %c0_i32 = arith.constant 0 : i32
    %c0_i32_0 = arith.constant 0 : i32
    return %arg0, %c0_i32 : i32, i32
  }
}

</mosaic_0001>

<bundles_post_ra>
// kernel: tpu_custom_call.1
= control target key start
LH: loop header
LB: loop body
LE: loop exit
PB: predicated region body
PF: predicated region fallthrough
CT: control target
= control target key end

     0   :  { %vm48_vm0 = vcmask 1043456   ;;  %vm41_vm1 = vcmask 64512   ;;  %v467_v8 = vmov 0.0|0.0   ;;  %vm468_vm2 = vmmov 0   ;;  %s593_s1 = inlined_call_operand.vmem [shape: bf16[24,64], index: 1, kind: input, shape index: {}]   ;;  %s594_s0 = inlined_call_operand.vmem [shape: bf16[32,8], index: 0, kind: input, shape index: {}]   ;;  %s595_s2 = inlined_call_operand.vmem [shape: f32[1,64], index: 2, kind: input, shape index: {}]   ;;  %s596_s5 = inlined_call_operand.vmem [shape: f32[2,32], index: 5, kind: input, shape index: {}]   ;;  %s597_s4 = inlined_call_operand.<no memory space> [shape: f32[1,1], index: 4, kind: input, shape index: {}]   ;;  %s598_s3 = inlined_call_operand.vmem [shape: f32[1,64], index: 3, kind: input, shape index: {}]   ;;  %s599_s6 = inlined_call_operand.vmem [shape: f32[2,1], index: 6, kind: output, shape index: {}]  }
   0x1   :  { %v30_v0 = vld [vmem:[%s593_s1] sm:$0xf]  ;;  %v102_v3 = vld [vmem:[%s593_s1 + $0x8] sm:$0xf]  ;;  %v101_v6 = vld [vmem:[%s593_s1 + $0x4] sm:$0xf]  ;;  %v155_v10 = vlaneseq }
   0x2   :  { %459 = vmatprep.subr.msk.bf16.mxu0 %vm48_vm0, %v30_v0  ;;  %v50_v1 = vsel %vm48_vm0, %v30_v0, 0  ;;  %v465_v2 = vld [vmem:[%s594_s0] sm:$0xff]   ;;  %460 = vmatprep.subr.msk.bf16.mxu1 %vm48_vm0, %v102_v3  ;;  %v466_v4 = vld [vmem:[%s594_s0 + $0x8] sm:$0xff]   ;;  %v104_v5 = vsel %vm48_vm0, %v102_v3, 0  ;;  %v190_v7 = vsel %vm48_vm0, %v101_v6, 0  ;;  %v469_v9 = vmov 0.0  }
   0x3   :  { %425 = vmatpush3.bf16.msra.mxu0 %v50_v1  ;;  %426 = vmatprep.mubr.msk.bf16.mxu0 %vm41_vm1, %v465_v2  ;;  %v533_v11 = vshrl.u32 %v155_v10, 7  ;;  %v406_v50 = vld [vmem:[%s595_s2] ss:$0 sm:$0xff]  ;;  %vm298_vm9 = vcmask 261120   ;;  %vm380_vm10 = vcmask 517120   ;;  %vm392_vm11 = vcmask 1024  }
   0x4   :  { %431 = vmatpush3.bf16.msra.mxu1 %v104_v5  ;;  %461 = vmatprep.subr.msk.bf16.mxu0 %vm48_vm0, %v101_v6 }
   0x5   :  { %432 = vmatprep.mubr.msk.bf16.mxu1 %vm41_vm1, %v465_v2  ;;  %453 = vmatprep.subr.bf16.mxu1 %v467_v8  ;;  %v158_v12 = vadd.s32 16, %v533_v11  ;;  %v160_v15 = vand.u32 15, %v533_v11  ;;  %v159_v18 = vadd.s32 24, %v533_v11  ;;  %vm172_vm3 = vcmp.lt.s32.totalorder %v533_v11, 1 }
   0x6   :  { %427 = vmatmul.mubr.msk.bf16.vlgmr.msra.gmra.mrb[0].mxu0 %vm41_vm1, %v466_v4  ;;  %v157_v23 = vadd.s32 8, %v533_v11  ;;  %vm249_vm4 = vcmp.lt.s32.totalorder %v533_v11, 7  ;;  %v11_v11 = vstv %s597_s4 }
   0x7   :  { %437 = vmatpush3.bf16.msra.mxu0 %v190_v7  ;;  %433 = vmatmul.mubr.msk.bf16.vlgmr.msra.gmra.mrb[0].mxu1 %vm41_vm1, %v466_v4  ;;  %v162_v14 = vand.u32 15, %v158_v12  ;;  %vm545_vm6 = vcmp.eq.s32.totalorder %v160_v15, 0  ;;  %v163_v36 = vand.u32 15, %v159_v18  ;;  %12 = vst [vmem:[#allocation2] sm:$0x1] %v11_v11 }
   0x8   :  { %438 = vmatprep.mubr.msk.bf16.mxu0 %vm41_vm1, %v465_v2  ;;  %450 = vmatprep.mubr.msk.f32.mxu1 %vm468_vm2, %v469_v9  ;;  %v161_v41 = vand.u32 15, %v157_v23  ;;  %v408_v23 = vld [vmem:[%s598_s3] ss:$0 sm:$0xff] }
   0x9   :  { %vm541_vm5 = vcmp.eq.s32.totalorder %v162_v14, 0  ;;  %vm244_vm7 = vcmp.eq.s32.totalorder %v163_v36, 15 }
   0xa   :  { %vm242_vm8 = vcmp.eq.s32.totalorder %v161_v41, 15 }
   0xe   :  { %439 = vmatmul.mubr.msk.bf16.vlgmr.msra.gmra.mrb[4].mxu0 %vm41_vm1, %v466_v4 }
  0xd9   :  { %v428_v13 = vpop.f32.mrb[0].mxu0 }
  0xda   :  { %v86_v16 = vpop.f32.mrb[1].mxu0  ;;  %v434_v17 = vpop.f32.mrb[0].mxu1  ;;  %v170_v24 = vrot.slane %v428_v13, 7 }
  0xdb   :  { %v168_v19 = vrot.slane %v86_v16, 7  ;;  %v429_v20 = vpop.f32.mrb[2].mxu0  ;;  %v247_v21 = vrot.slane %v434_v17, 1  ;;  %v140_v22 = vpop.f32.mrb[1].mxu1 }
  0xdc   :  { %v171_v25 = vrot.slane %v429_v20, 7  ;;  %v89_v26 = vpop.f32.mrb[3].mxu0  ;;  %v245_v27 = vrot.slane %v140_v22, 1  ;;  %v435_v28 = vpop.f32.mrb[2].mxu1  ;;  %v297_v22 = vld [vmem:[%s596_s5] sm:$0x3] }
  0xdd   :  { %v169_v29 = vrot.slane %v89_v26, 7  ;;  %v248_v30 = vrot.slane %v435_v28, 1  ;;  %v143_v31 = vpop.f32.mrb[3].mxu1 }
  0xde   :  { %v246_v34 = vrot.slane %v143_v31, 1  ;;  %v176_v35 = vsel %vm172_vm3, %v171_v25, %v168_v19  ;;  %v173_v37 = vsel %vm172_vm3, %v170_v24, %v171_v25 }
  0xdf   :  { %v174_v38 = vsel %vm172_vm3, %v169_v29, %v170_v24  ;;  %v250_v39 = vsel %vm249_vm4, %v247_v21, %v248_v30  ;;  %v253_v40 = vsel %vm249_vm4, %v248_v30, %v245_v27  ;;  %v175_v44 = vsel %vm172_vm3, %v168_v19, %v169_v29 }
  0xe0   :  { %v187_v42 = vsel %vm541_vm5, 0.0, %v174_v38  ;;  %v252_v43 = vsel %vm249_vm4, %v245_v27, %v246_v34  ;;  %v251_v46 = vsel %vm249_vm4, %v246_v34, %v247_v21  ;;  %v185_v48 = vsel %vm545_vm6, 0.0, %v176_v35  ;;  %v409_v27 = vld [vmem:[#allocation2] ss:$0 sm:$0xff] }
  0xe1   :  { %v440_v45 = vpop.f32.mrb[4].mxu0  ;;  %v265_v57 = vsel %vm244_vm7, 0.0, %v253_v40  ;;  %v263_v61 = vsel %vm242_vm8, 0.0, %v251_v46 }
  0xe2   :  { %v235_v47 = vadd.f32 %v440_v45, %v187_v42  ;;  %v226_v49 = vpop.f32.mrb[5].mxu0 }
  0xe3   :  { %v227_v51 = vadd.f32 %v226_v49, %v185_v48  ;;  %v441_v52 = vpop.f32.mrb[6].mxu0 }
  0xe4   :  { %v268_v53 = vadd.f32 %v250_v39, %v235_v47  ;;  %v238_v54 = vadd.f32 %v441_v52, %v173_v37  ;;  %v229_v55 = vpop.f32.mrb[7].mxu0 }
  0xe5   :  { %v266_v56 = vadd.f32 %v252_v43, %v227_v51  ;;  %v230_v58 = vadd.f32 %v229_v55, %v175_v44 }
  0xe6   :  { %v279_v59 = vadd.f32 %v406_v50, %v268_v53  ;;  %v269_v60 = vadd.f32 %v265_v57, %v238_v54 }
  0xe7   :  { %v277_v62 = vadd.f32 %v406_v50, %v266_v56  ;;  %v267_v63 = vadd.f32 %v263_v61, %v230_v58 }
  0xe8   :  { %v283_v0 = vmax.f32 %v279_v59, 0.0  ;;  %v280_v1 = vadd.f32 %v406_v50, %v269_v60 }
  0xe9   :  { %v281_v2 = vmax.f32 %v277_v62, 0.0  ;;  %v278_v3 = vadd.f32 %v406_v50, %v267_v63 }
  0xea   :  { %v284_v4 = vmax.f32 %v280_v1, 0.0  ;;  %v287_v7 = vrot.slane %v283_v0, 1 }
  0xeb   :  { %v285_v5 = vrot.slane %v281_v2, 1  ;;  %v282_v6 = vmax.f32 %v278_v3, 0.0 }
  0xec   :  { %v288_v9 = vrot.slane %v284_v4, 1 }
  0xed   :  { %v286_v10 = vrot.slane %v282_v6, 1 }
  0xee   :  { %v292_v12 = vsel %vm249_vm4, %v288_v9, %v285_v5  ;;  %v289_v13 = vsel %vm249_vm4, %v287_v7, %v288_v9 }
  0xef   :  { %v296_v14 = vmax.f32 %v284_v4, %v292_v12  ;;  %v290_v15 = vsel %vm249_vm4, %v286_v10, %v287_v7  ;;  %v291_v16 = vsel %vm249_vm4, %v285_v5, %v286_v10  ;;  %v295_v17 = vmax.f32 %v283_v0, %v289_v13 }
  0xf0   :  { %v294_v18 = vmax.f32 %v282_v6, %v290_v15  ;;  %v293_v19 = vmax.f32 %v281_v2, %v291_v16 }
  0xf1   :  { %v457_v20 = vpack.c.bf16 %v296_v14, %v295_v17 }
  0xf2   :  { %v454_v21 = vpack.c.bf16 %v294_v18, %v293_v19 }
  0xf4   :  { %455 = vmatpush3.bf16.msra.mxu1 %v454_v21 }
  0xf5   :  { %456 = vmatprep.subr.bf16.mxu1 %v467_v8 }
  0xf8   :  { %458 = vmatpush3.bf16.msra.mxu1 %v457_v20 }
  0xfb   :  { %451 = vmatmul.mubr.msk.f32.vlgmr.msra.gmra.mrb[4].mxu1 %vm298_vm9, %v297_v22 }
 0x1ce   :  { %v368_v24 = vpop.f32.mrb[4].mxu1 }
 0x1cf   :  { %v379_v25 = vmul.f32 %v408_v23, %v368_v24  ;;  %v452_v8 = vpop.f32.mrb[5].mxu1 }
 0x1d1   :  { %v381_v26 = vsel %vm380_vm10, %v379_v25, 0.0 }
 0x1d2   :  { %382 = vadd.xlane.f32.xlu0 %v381_v26 }
 0x25f   :  { %v383_v28 = vpop.xlane.xlu0 %382 }
 0x260   :  { %v391_v29 = vadd.f32 %v409_v27, %v383_v28 }
 0x262   :  { %393 = vst.msk [vmem:[%s599_s6] sm:$0x3] %vm392_vm11, %v391_v29 }

</bundles_post_ra>
